<compile_context>
chip_gen: v7x
topology: tpu7x:2x2x1
jax: 0.10.0
libtpu: 0.0.40
codegen_flags: <defaults>
</compile_context>

<pallas_src>
import jax
import jax.numpy as jnp
from jax.experimental import pallas as pl
from jax.experimental.pallas import tpu as pltpu


# ----------------------------------------------------------------------------- #
# Fused kernel: dem FC + broadcast + causal nonzero-average pooling + ReLU.
# One grid step processes a block of Nb batch elements.
# ----------------------------------------------------------------------------- #
def _patient_mean_kernel(ts_ref, dem_ref, w1_ref, b1_ref, w2_ref, b2_ref, out_ref):
    Nb, L, C_in = ts_ref.shape
    dem_out = w2_ref.shape[1]

    # ---- demographics branch, batched over the whole Nb block (one MXU pass) ----
    d = dem_ref[...][:, 0, :].astype(jnp.float32)                      # (Nb, dem_in)
    h = jnp.dot(d, w1_ref[...], preferred_element_type=jnp.float32) + b1_ref[...]
    h = jnp.maximum(h, 0.0)
    # Dropout(p=dem_dropout=0.0) is the identity at inference.
    e = jnp.dot(h, w2_ref[...], preferred_element_type=jnp.float32) + b2_ref[...]
    e = jnp.maximum(e, 0.0)                                            # (Nb, dem_out), >= 0

    # ---- causal nonzero-average pooling: log2(L)-step shift-add scan ----
    # Values and nonzero counts ride in ONE lane-concatenated array, so every scan
    # step is a single shift + add over shared vregs; everything stays exact f32 on
    # the VPU (no MXU, no (L,L) mask, no O(Nb*L^2) temp).
    x = ts_ref[...].astype(jnp.float32)                                # (Nb, L, C_in)
    nz = (x != 0.0).astype(jnp.float32)
    sc = jnp.concatenate([x, nz], axis=-1)                             # (Nb, L, 2*C_in)
    shift = 1
    while shift < L:                                                   # unrolled at trace time
        prev = jnp.concatenate(
            [jnp.zeros((Nb, shift, 2 * C_in), jnp.float32),
             sc[:, : L - shift, :]],
            axis=1)
        sc = sc + prev
        shift *= 2
    csum = sc[:, :, :C_in]                                             # sum over 0..t
    ccnt = sc[:, :, C_in:]                                             # nonzero count 0..t
    p = jnp.maximum(csum / jnp.maximum(ccnt, 1.0), 0.0)                # pool + final ReLU

    # ---- ONE full-tile store of the concatenated result ----
    # Dem columns are constant over time and e >= 0 (post-ReLU), so their causal
    # nonzero-average (and its ReLU) equals e itself: broadcast instead of pooling.
    e_b = jnp.broadcast_to(e[:, None, :], (Nb, L, dem_out))
    out_ref[...] = jnp.concatenate([p, e_b], axis=-1).astype(out_ref.dtype)


def patient_mean_encoder_forward(timesteps, dem, params, *, batch_block=None):
    """timesteps: (N, L, C_in); dem: (N, dem_in). Returns ((N, L, C_in+20), {})."""
    N, L, C_in = timesteps.shape
    dem_in = dem.shape[1]
    dem_out = params["w2"].shape[1]
    C_out = C_in + dem_out

    if batch_block is None:
        # Per-batch-element VMEM footprint: double-buffered in+out tiles plus the
        # live f32 temps of the scan (x, nz, sc, shifted, p, e_bcast, packed out).
        io_bytes = 2 * (C_in + C_out) * L * 4
        tmp_bytes = (6 * C_in + 2 * C_out) * L * 4
        per_elem = io_bytes + tmp_bytes
        budget = 24 * 1024 * 1024            # stays well under the 48 MiB limit below
        cap = max(1, budget // per_elem)
        # Keep >= 2 grid steps so v7x's two TensorCores both get work
        # (no-op on single-TC v5e/v6e).
        batch_block = max(1, min(cap, pl.cdiv(N, 2)))
    Nb = batch_block
    grid_n = pl.cdiv(N, Nb)
    N_pad = grid_n * Nb

    ts = timesteps
    dm = dem
    if N_pad != N:
        # cdiv grid + padding: block size independent of N's factorization.
        ts = jnp.pad(ts, ((0, N_pad - N), (0, 0), (0, 0)))
        dm = jnp.pad(dm, ((0, N_pad - N), (0, 0)))
    # Reshape dem to (N, 1, dem_in) so the batch-block dim is not a tiled (8,128) dim.
    dem3 = dm.reshape(N_pad, 1, dem_in)
    w1, b1, w2, b2 = params["w1"], params["b1"], params["w2"], params["b2"]

    out = pl.pallas_call(
        _patient_mean_kernel,
        out_shape=jax.ShapeDtypeStruct((N_pad, L, C_out), timesteps.dtype),
        grid=(grid_n,),
        in_specs=[
            pl.BlockSpec((Nb, L, C_in), lambda b: (b, 0, 0)),
            pl.BlockSpec((Nb, 1, dem_in), lambda b: (b, 0, 0)),
            pl.BlockSpec(w1.shape, lambda b: (0, 0)),
            pl.BlockSpec(b1.shape, lambda b: (0, 0)),
            pl.BlockSpec(w2.shape, lambda b: (0, 0)),
            pl.BlockSpec(b2.shape, lambda b: (0, 0)),
        ],
        out_specs=pl.BlockSpec((Nb, L, C_out), lambda b: (b, 0, 0)),
        compiler_params=pltpu.CompilerParams(
            dimension_semantics=("parallel",),
            vmem_limit_bytes=48 * 1024 * 1024),
    )(ts, dem3, w1, b1, w2, b2)
    return out[:N], {}


# ----------------------------------------------------------------------------- #
# Pure-JAX reference (mirrors the PyTorch forward: concat, left-pad, causal
# nonzero-average pool, ReLU) for validation.
# ----------------------------------------------------------------------------- #
def _reference(timesteps, dem, params):
    h = jnp.maximum(dem @ params["w1"] + params["b1"], 0.0)
    e = jnp.maximum(h @ params["w2"] + params["b2"], 0.0)
    N, L, _ = timesteps.shape
    z = jnp.concatenate(
        [timesteps, jnp.broadcast_to(e[:, None, :], (N, L, e.shape[-1]))], axis=-1)
    csum = jnp.cumsum(z, axis=1)
    ccnt = jnp.cumsum((z != 0.0).astype(jnp.float32), axis=1)
    p = csum / jnp.maximum(ccnt, 1.0)
    return jnp.maximum(p, 0.0)


if __name__ == "__main__":
    N, L, C_IN = 2, 8, 16             # batch, seq len, timestep embedding size
    DEM_IN, H1, DEM_OUT = 10, 40, 20  # module defaults: Linear(10,40) -> Linear(40,20)

    key = jax.random.PRNGKey(0)
    kx, kz, kd, k1, k2, k3, k4 = jax.random.split(key, 7)
    timesteps = jax.random.normal(kx, (N, L, C_IN), jnp.float32)
    # Inject exact zeros so the nonzero-count normalization path is exercised.
    timesteps = jnp.where(jax.random.bernoulli(kz, 0.3, (N, L, C_IN)), 0.0, timesteps)
    dem = jax.random.normal(kd, (N, DEM_IN), jnp.float32)
    params = {
        "w1": jax.random.normal(k1, (DEM_IN, H1), jnp.float32) / jnp.sqrt(DEM_IN),
        "b1": 0.1 * jax.random.normal(k2, (1, H1), jnp.float32),
        "w2": jax.random.normal(k3, (H1, DEM_OUT), jnp.float32) / jnp.sqrt(H1),
        "b2": 0.1 * jax.random.normal(k4, (1, DEM_OUT), jnp.float32),
    }

    out, extras = patient_mean_encoder_forward(timesteps, dem, params)
    out = jax.block_until_ready(out)

    ref = _reference(timesteps, dem, params)
    assert out.shape == (N, L, C_IN + DEM_OUT)
    assert extras == {}
    # Pooling path is exact f32 on the VPU now; tolerance only covers the small
    # dem-branch matmuls that may take a reduced-precision f32 MXU path.
    assert jnp.allclose(out, ref, atol=1e-2, rtol=1e-2)

    print("KERNEL_OK")
</pallas_src>

<mosaic_0001>
module attributes {stable_mosaic.version = 11 : i64} {
  func.func @_patient_mean_kernel(%arg0: i32, %arg1: memref<1x8x16xf32, #tpu.memory_space<vmem>>, %arg2: memref<1x1x10xf32, #tpu.memory_space<vmem>>, %arg3: memref<10x40xf32, #tpu.memory_space<vmem>>, %arg4: memref<1x40xf32, #tpu.memory_space<vmem>>, %arg5: memref<40x20xf32, #tpu.memory_space<vmem>>, %arg6: memref<1x20xf32, #tpu.memory_space<vmem>>, %arg7: memref<1x8x36xf32, #tpu.memory_space<vmem>>) attributes {dimension_semantics = [#tpu.dimension_semantics<parallel>], iteration_bounds = array<i64: 2>, scalar_prefetch = 0 : i64, scratch_operands = 0 : i64, tpu.core_type = #tpu.core_type<tc>, window_params = [{transform_indices = @transform_0, window_bounds = array<i64: 1, 8, 16>}, {transform_indices = @transform_1, window_bounds = array<i64: 1, 1, 10>}, {pipeline_mode = #tpu.pipeline_mode<synchronous>, transform_indices = @transform_2, window_bounds = array<i64: 10, 40>}, {pipeline_mode = #tpu.pipeline_mode<synchronous>, transform_indices = @transform_3, window_bounds = array<i64: 1, 40>}, {pipeline_mode = #tpu.pipeline_mode<synchronous>, transform_indices = @transform_4, window_bounds = array<i64: 40, 20>}, {pipeline_mode = #tpu.pipeline_mode<synchronous>, transform_indices = @transform_5, window_bounds = array<i64: 1, 20>}, {transform_indices = @transform_6, window_bounds = array<i64: 1, 8, 36>}]} {
    %c0 = arith.constant 0 : index
    %c0_0 = arith.constant 0 : index
    %c0_1 = arith.constant 0 : index
    %0 = vector.load %arg2[%c0, %c0_0, %c0_1] : memref<1x1x10xf32, #tpu.memory_space<vmem>>, vector<1x1x10xf32>
    %1 = vector.shape_cast %0 : vector<1x1x10xf32> to vector<1x10xf32>
    %c0_2 = arith.constant 0 : index
    %c0_3 = arith.constant 0 : index
    %2 = vector.load %arg3[%c0_2, %c0_3] : memref<10x40xf32, #tpu.memory_space<vmem>>, vector<10x40xf32>
    %cst = arith.constant dense<0.000000e+00> : vector<1x40xf32>
    %3 = tpu.matmul %1, %2, %cst {dimension_numbers = #tpu.dot_dimension_numbers<[1], [0], [0], [1], [0, 0, 1, 1], [], []>} : vector<1x10xf32>, vector<10x40xf32>, vector<1x40xf32> -> vector<1x40xf32>
    %c0_4 = arith.constant 0 : index
    %c0_5 = arith.constant 0 : index
    %4 = vector.load %arg4[%c0_4, %c0_5] : memref<1x40xf32, #tpu.memory_space<vmem>>, vector<1x40xf32>
    %5 = arith.addf %3, %4 : vector<1x40xf32>
    %cst_6 = arith.constant 0.000000e+00 : f32
    %6 = vector.broadcast %cst_6 : f32 to vector<1x40xf32>
    %7 = arith.maximumf %5, %6 : vector<1x40xf32>
    %c0_7 = arith.constant 0 : index
    %c0_8 = arith.constant 0 : index
    %8 = vector.load %arg5[%c0_7, %c0_8] : memref<40x20xf32, #tpu.memory_space<vmem>>, vector<40x20xf32>
    %cst_9 = arith.constant dense<0.000000e+00> : vector<1x20xf32>
    %9 = tpu.matmul %7, %8, %cst_9 {dimension_numbers = #tpu.dot_dimension_numbers<[1], [0], [0], [1], [0, 0, 1, 1], [], []>} : vector<1x40xf32>, vector<40x20xf32>, vector<1x20xf32> -> vector<1x20xf32>
    %c0_10 = arith.constant 0 : index
    %c0_11 = arith.constant 0 : index
    %10 = vector.load %arg6[%c0_10, %c0_11] : memref<1x20xf32, #tpu.memory_space<vmem>>, vector<1x20xf32>
    %11 = arith.addf %9, %10 : vector<1x20xf32>
    %cst_12 = arith.constant 0.000000e+00 : f32
    %12 = vector.broadcast %cst_12 : f32 to vector<1x20xf32>
    %13 = arith.maximumf %11, %12 : vector<1x20xf32>
    %c0_13 = arith.constant 0 : index
    %c0_14 = arith.constant 0 : index
    %c0_15 = arith.constant 0 : index
    %14 = vector.load %arg1[%c0_13, %c0_14, %c0_15] : memref<1x8x16xf32, #tpu.memory_space<vmem>>, vector<1x8x16xf32>
    %cst_16 = arith.constant 0.000000e+00 : f32
    %15 = vector.broadcast %cst_16 : f32 to vector<1x8x16xf32>
    %16 = arith.cmpf one, %14, %15 : vector<1x8x16xf32>
    %17 = arith.extui %16 : vector<1x8x16xi1> to vector<1x8x16xi32>
    %18 = arith.sitofp %17 : vector<1x8x16xi32> to vector<1x8x16xf32>
    %19 = tpu.concatenate %14, %18 in 2 : vector<1x8x16xf32>, vector<1x8x16xf32> -> vector<1x8x32xf32>
    %cst_17 = arith.constant 0.000000e+00 : f32
    %20 = vector.broadcast %cst_17 : f32 to vector<1x1x32xf32>
    %21 = vector.extract_strided_slice %19 {offsets = [0, 0, 0], sizes = [1, 7, 32], strides = [1, 1, 1]} : vector<1x8x32xf32> to vector<1x7x32xf32>
    %22 = tpu.concatenate %20, %21 in 1 : vector<1x1x32xf32>, vector<1x7x32xf32> -> vector<1x8x32xf32>
    %23 = arith.addf %19, %22 : vector<1x8x32xf32>
    %cst_18 = arith.constant 0.000000e+00 : f32
    %24 = vector.broadcast %cst_18 : f32 to vector<1x2x32xf32>
    %25 = vector.extract_strided_slice %23 {offsets = [0, 0, 0], sizes = [1, 6, 32], strides = [1, 1, 1]} : vector<1x8x32xf32> to vector<1x6x32xf32>
    %26 = tpu.concatenate %24, %25 in 1 : vector<1x2x32xf32>, vector<1x6x32xf32> -> vector<1x8x32xf32>
    %27 = arith.addf %23, %26 : vector<1x8x32xf32>
    %cst_19 = arith.constant 0.000000e+00 : f32
    %28 = vector.broadcast %cst_19 : f32 to vector<1x4x32xf32>
    %29 = vector.extract_strided_slice %27 {offsets = [0, 0, 0], sizes = [1, 4, 32], strides = [1, 1, 1]} : vector<1x8x32xf32> to vector<1x4x32xf32>
    %30 = tpu.concatenate %28, %29 in 1 : vector<1x4x32xf32>, vector<1x4x32xf32> -> vector<1x8x32xf32>
    %31 = arith.addf %27, %30 : vector<1x8x32xf32>
    %32 = vector.extract_strided_slice %31 {offsets = [0, 0, 0], sizes = [1, 8, 16], strides = [1, 1, 1]} : vector<1x8x32xf32> to vector<1x8x16xf32>
    %33 = vector.extract_strided_slice %31 {offsets = [0, 0, 16], sizes = [1, 8, 16], strides = [1, 1, 1]} : vector<1x8x32xf32> to vector<1x8x16xf32>
    %cst_20 = arith.constant 1.000000e+00 : f32
    %34 = vector.broadcast %cst_20 : f32 to vector<1x8x16xf32>
    %35 = arith.maximumf %33, %34 : vector<1x8x16xf32>
    %36 = arith.divf %32, %35 : vector<1x8x16xf32>
    %cst_21 = arith.constant 0.000000e+00 : f32
    %37 = vector.broadcast %cst_21 : f32 to vector<1x8x16xf32>
    %38 = arith.maximumf %36, %37 : vector<1x8x16xf32>
    %39 = vector.shape_cast %13 : vector<1x20xf32> to vector<1x1x20xf32>
    %40 = vector.shape_cast %39 : vector<1x1x20xf32> to vector<1x1x20xf32>
    %41 = vector.broadcast %40 : vector<1x1x20xf32> to vector<1x8x20xf32>
    %42 = tpu.concatenate %38, %41 in 2 : vector<1x8x16xf32>, vector<1x8x20xf32> -> vector<1x8x36xf32>
    %c0_22 = arith.constant 0 : index
    %c0_23 = arith.constant 0 : index
    %c0_24 = arith.constant 0 : index
    %43 = vector.load %arg7[%c0_22, %c0_23, %c0_24] : memref<1x8x36xf32, #tpu.memory_space<vmem>>, vector<1x8x36xf32>
    tpu.vector_store %arg7[%c0_22, %c0_23, %c0_24], %42 {strides = array<i32>} : memref<1x8x36xf32, #tpu.memory_space<vmem>>, vector<1x8x36xf32>,
    return
  }
  func.func @transform_0(%arg0: i32) -> (i32, i32, i32) {
    %c0_i32 = arith.constant 0 : i32
    %c0_i32_0 = arith.constant 0 : i32
    %c0_i32_1 = arith.constant 0 : i32
    return %arg0, %c0_i32, %c0_i32_0 : i32, i32, i32
  }
  func.func @transform_1(%arg0: i32) -> (i32, i32, i32) {
    %c0_i32 = arith.constant 0 : i32
    %c0_i32_0 = arith.constant 0 : i32
    %c0_i32_1 = arith.constant 0 : i32
    return %arg0, %c0_i32, %c0_i32_0 : i32, i32, i32
  }
  func.func @transform_2(%arg0: i32) -> (i32, i32) {
    %c0_i32 = arith.constant 0 : i32
    %c0_i32_0 = arith.constant 0 : i32
    %c0_i32_1 = arith.constant 0 : i32
    return %c0_i32, %c0_i32_0 : i32, i32
  }
  func.func @transform_3(%arg0: i32) -> (i32, i32) {
    %c0_i32 = arith.constant 0 : i32
    %c0_i32_0 = arith.constant 0 : i32
    %c0_i32_1 = arith.constant 0 : i32
    return %c0_i32, %c0_i32_0 : i32, i32
  }
  func.func @transform_4(%arg0: i32) -> (i32, i32) {
    %c0_i32 = arith.constant 0 : i32
    %c0_i32_0 = arith.constant 0 : i32
    %c0_i32_1 = arith.constant 0 : i32
    return %c0_i32, %c0_i32_0 : i32, i32
  }
  func.func @transform_5(%arg0: i32) -> (i32, i32) {
    %c0_i32 = arith.constant 0 : i32
    %c0_i32_0 = arith.constant 0 : i32
    %c0_i32_1 = arith.constant 0 : i32
    return %c0_i32, %c0_i32_0 : i32, i32
  }
  func.func @transform_6(%arg0: i32) -> (i32, i32, i32) {
    %c0_i32 = arith.constant 0 : i32
    %c0_i32_0 = arith.constant 0 : i32
    %c0_i32_1 = arith.constant 0 : i32
    return %arg0, %c0_i32, %c0_i32_0 : i32, i32, i32
  }
}

</mosaic_0001>

<bundles_post_ra>
// kernel: tpu_custom_call.1
= control target key start
LH: loop header
LB: loop body
LE: loop exit
PB: predicated region body
PF: predicated region fallthrough
CT: control target
= control target key end

     0   :  { %11 = vsyncpa [#allocation3], 0  ;;  %s895_s0 = inlined_call_operand.vmem [shape: f32[2,8,16], index: 0, kind: input, shape index: {}]   ;;  %s896_s1 = inlined_call_operand.vmem [shape: f32[2,1,10], index: 1, kind: input, shape index: {}]   ;;  %s897_s2 = inlined_call_operand.vmem [shape: f32[10,40], index: 2, kind: input, shape index: {}]   ;;  %s898_s3 = inlined_call_operand.vmem [shape: f32[1,40], index: 3, kind: input, shape index: {}]   ;;  %s899_s4 = inlined_call_operand.vmem [shape: f32[40,20], index: 4, kind: input, shape index: {}]   ;;  %s900_s5 = inlined_call_operand.vmem [shape: f32[1,20], index: 5, kind: input, shape index: {}]   ;;  %s901_s6 = inlined_call_operand.hbm [shape: f32[2,8,36], index: 6, kind: output, shape index: {}]  }
   0x1   :  { %13 = vsyncpa [#allocation3 + $0x1], 0  ;;  %s759_s21 = smov 0   ;;  %s761_s22 = smov 0  }
   0x2   :  { %s763_s23 = smov 0   ;;  %s765_s24 = smov 0  }
   0x3 LB: > { %s780_s25 = sadd.s32 4294967295, %s715_s24   ;;  %s553_s26 = sadd.s32 4294967294, %s715_s24   ;;  %s715_s24 = sphi %s765_s24, %s907_s24   ;;  %s711_s23 = sphi %s763_s23, %s906_s23   ;;  %s707_s22 = sphi %s761_s22, %s905_s22   ;;  %s703_s21 = sphi %s759_s21, %s904_s21  }
   0x4   : > { %s784_s27 = sadd.s32 1, %s715_s24   ;;  %s162_s28 = sadd.s32 1, %s711_s23 }
   0x5   : > { %s159_s29 = ssub.s32 %s715_s24, %s784_s27  ;;  %p172_p0 = scmp.ne.s32.totalorder %s711_s23, %s707_s22 }
   0x6   : > { %p160_p1 = scmp.eq.s32.totalorder %s159_s29, 0  ;;  %p173_p2 = scmp.eq.s32.totalorder %s780_s25, 1 }
   0x7   : > { %p178_p3 = scmp.ne.s32.totalorder %s707_s22, %s703_s21  ;;  %p179_p4 = scmp.eq.s32.totalorder %s553_s26, 1 }
   0x8   : > { %s795_s30 = scalar_select %p160_p1, %s711_s23, %s162_s28  }
   0x9   : > { %p797_p5 = por %p173_p2, %p172_p0  ;;  %p801_p6 = por %p179_p4, %p178_p3 }
   0xa   : > { %p556_p7 = scmp.ge.s32.totalorder %s715_s24, 1  ;;  %p222_p8 = scmp.lt.s32.totalorder %s715_s24, 3 }
   0xc   : > { %p223_p9 = pnand %p556_p7, %p222_p8 }
   0xd   : > { %v262_v0 = vld [vmem:[%s897_s2] sm:$0xff] (!%p223_p9)  ;;  %v263_v1 = vld [vmem:[%s897_s2 + $0x8] sm:$0x3] (!%p223_p9)  ;;  %vm269_vm0 = vcmask (!%p223_p9), 1041408   ;;  %v717_v2 = vmov (!%p223_p9), 0.0|0.0   ;;  %vm718_vm1 = vmmov (!%p223_p9), 1   ;;  %v460_v32 = vlaneseq (!%p223_p9) }
   0xe   : > { %226 = sbr.rel (%p223_p9) target bundleno = 589 (0x24d), region = 44  ;;  %596 = vmatprep.subr.bf16.mxu0 (!%p223_p9), %v717_v2  ;;  %v597_v3 = vpack.c.bf16 (!%p223_p9), %v263_v1, %v262_v0  ;;  %vm598_vm2 = vmpackc.low (!%p223_p9), %vm269_vm0, %vm718_vm1  ;;  %p254_p10 = scmp.lt.s32.totalorder (!%p223_p9), %s780_s25, 1  ;;  %600 = vmatprep.subr.bf16.mxu1 (!%p223_p9), %v717_v2  ;;  %v344_v4 = vld [vmem:[%s899_s4] sm:$0xff] (!%p223_p9)  ;;  %vm719_vm3 = vmmov (!%p223_p9), 0   ;;  %v720_v5 = vmov (!%p223_p9), 0.0   ;;  %v345_v6 = vld [vmem:[%s899_s4 + $0x8] sm:$0xff] (!%p223_p9) }
   0xf   : > { %580 = vmatprep.mubr.msk.f32.mxu0 (!%p223_p9), %vm719_vm3, %v720_v5  ;;  %593 = vmatprep.mubr.msk.f32.mxu1 (!%p223_p9), %vm719_vm3, %v720_v5  ;;  %v601_v7 = vpack.c.bf16 (!%p223_p9), %v345_v6, %v344_v4  ;;  %vm265_vm4 = vcmask (!%p223_p9), 80896   ;;  %s721_s10 = smov (!%p223_p9), 16   ;;  %v346_v11 = vld [vmem:[%s899_s4 + $0x10] sm:$0xff] (!%p223_p9)  ;;  %v347_v12 = vld [vmem:[%s899_s4 + $0x18] sm:$0xff] (!%p223_p9)  ;;  %v348_v14 = vld [vmem:[%s899_s4 + $0x20] sm:$0xff] (!%p223_p9)  ;;  %vm433_vm6 = vcmask (!%p223_p9), 130048  }
  0x10   : > { %599 = vmatpush3.bf16.msk.msra.mxu0 (!%p223_p9), %vm598_vm2, %v597_v3  ;;  %v604_v13 = vpack.c.bf16 (!%p223_p9), %v347_v12, %v346_v11  ;;  %vm438_vm7 = vcmask (!%p223_p9), 1040384   ;;  %vm449_vm8 = vcmask (!%p223_p9), 1043456   ;;  %v264_v27 = vld [vmem:[%s898_s3] sm:$0x1] (!%p223_p9)  ;;  %vm350_vm9 = vcmask (!%p223_p9), 326656   ;;  %s251_s28 = sand.u32 (!%p223_p9), 1, %s707_s22  }
  0x11   : > { %602 = vmatpush3.bf16.msra.mxu1 (!%p223_p9), %v601_v7  ;;  %v461_v33 = vshrl.u32 (!%p223_p9), %v460_v32, 7  ;;  %v349_v34 = vld [vmem:[%s900_s5] sm:$0x1] (!%p223_p9)  ;;  %s557_s29 = sshll.u32 (!%p223_p9), %s251_s28, 3  ;;  %vm469_vm10 = vcmask (!%p223_p9), 293888   ;;  %s723_s16 = smov (!%p223_p9), [#allocation2]  }
  0x12   : > { %603 = vmatprep.subr.bf16.mxu1 (!%p223_p9), %v717_v2  ;;  %s253_s11 = scalar_lea.vmem (!%p223_p9), [#allocation2], %s557_s29 }
  0x13   : > { %v462_v38 = vsub.s32 (!%p223_p9), 0, %v461_v33  ;;  %s485_s12 = sshll.u32 (!%p223_p9), %s253_s11, 4  ;;  %s854_s12 = int_to_ptr.vmem [resolvable:$true] %s485_s12 }
  0x15   : > { %s255_s17 = scalar_select %p254_p10, %s780_s25, 1  ;;  %605 = vmatpush3.bf16.msra.mxu1 %v604_v13 }
  0x16   : > { %591 = vmatprep.subr.mxu1 %v720_v5 }
  0x17   : > { %s260_s20 = scalar_lea.vmem %s896_s1, %s255_s17  ;;  %s558_s26 = sshll.u32 %s255_s17, 3 }
  0x18   : > { %v261_v8 = vld [vmem:[%s260_s20] sm:$0x1]  ;;  %s257_s9 = scalar_lea.vmem %s895_s0, %s558_s26  ;;  %s722_s17 = smov 112  }
  0x19   : > { %581 = vmatmul.mubr.msk.f32.vlgmr.msra.gmra.mrb[0].mxu0 %vm265_vm4, %v261_v8  ;;  %v425_v9 = vld [vmem:[%s257_s9] sm:$0xff]  ;;  %592 = vmatpush3.msra.mxu1 %v348_v14  ;;  %s564_s9 = sshll.u32 %s780_s25, 7  ;;  %s653_s25 = scalar_lea.vmem %s854_s12, 128 }
  0x1a   : > { %vm426_vm5 = vcmp.ne.f32.partialorder %v425_v9, 0.0  ;;  %s852_s15 = scalar_lea.hbm %s901_s6, %s564_s9  ;;  %p654_p11 = scmp.ne.s32.totalorder %s854_s12, %s653_s25 }
  0x1b   : > { %v562_v10 = vsel %vm426_vm5, 1.0, %v720_v5 }
  0x1c   : > { %430 = vrot.lane.b32.xlu0 %v562_v10, %s721_s10  ;;  %p655_p12 = pnand %p654_p11, %p797_p5 }
  0x1e   : > { %p656_p13 = pneg %p655_p12 }
  0x8e   : > { %v431_v15 = vpop.permute.xlu0 %430 }
  0x8f   : > { %v434_v16 = vsel %vm433_vm6, %v425_v9, %v431_v15 }
  0x90   : > { %v436_v17 = vrot.slane %v434_v16, 7 }
  0x92   : > { %v439_v18 = vsel %vm438_vm7, 0.0, %v436_v17 }
  0x93   : > { %v440_v19 = vadd.f32 %v439_v18, %v434_v16 }
  0x95   : > { %v442_v20 = vrot.slane %v440_v19, 6 }
  0x97   : > { %v444_v21 = vsel %vm269_vm0, 0.0, %v442_v20 }
  0x98   : > { %v445_v22 = vadd.f32 %v444_v21, %v440_v19 }
  0x9a   : > { %v447_v23 = vrot.slane %v445_v22, 4 }
  0x9c   : > { %v450_v24 = vsel %vm449_vm8, 0.0, %v447_v23 }
  0x9d   : > { %v451_v25 = vadd.f32 %v450_v24, %v445_v22 }
  0x9f   : > { %v452_v26 = vmax.f32 %v451_v25, 1.0 }
  0xa1   : > { %454 = vrot.lane.b32.xlu0 %v452_v26, %s722_s17  ;;  %s657_s17 = sshll.u32 %s723_s16, 4  ;;  %s658_s17 = int_to_ptr.vmem [resolvable:$false] %s657_s17 }
  0xa2   : > { %s659_s18 = scalar_lea.vmem %s658_s17, 256  ;;  %p660_p0 = scmp.lt.s32.totalorder %s854_s12, %s658_s17 }
  0xa3   : > { %p661_p1 = scmp.lt.s32.totalorder %s659_s18, %s653_s25 }
  0xa5   : > { %p662_p2 = por %p661_p1, %p660_p0 }
  0xa7   : > { %p663_p3 = pnand %p662_p2, %p656_p13 }
  0xec   : > { %v339_v28 = vpop.f32.mrb[0].mxu0 }
  0xed   : > { %v340_v29 = vadd.f32 %v339_v28, %v264_v27  ;;  %v582_v30 = vpop.f32.mrb[1].mxu0 }
  0xef   : > { %v343_v31 = vmax.f32 %v340_v29, 0.0 }
  0xf1   : > { %594 = vmatmul.mubr.msk.f32.vlgmr.msra.gmra.mrb[0].mxu1 %vm350_vm9, %v343_v31 }
 0x113   : > { %v455_v41 = vpop.permute.xlu0 %454 }
 0x114   : > { %651 = vrcp.f32 %v455_v41 }
 0x11e   : > { %v652_v42 = vpop.eup %651 }
 0x11f   : > { %v458_v43 = vmul.f32 %v652_v42, %v451_v25 }
 0x121   : > { %v459_v44 = vmax.f32 %v458_v43, 0.0 }
 0x1c4   : > { %v420_v35 = vpop.f32.mrb[0].mxu1 }
 0x1c5   : > { %v421_v36 = vadd.f32 %v420_v35, %v349_v34  ;;  %v595_v37 = vpop.f32.mrb[1].mxu1 }
 0x1c7   : > { %v424_v39 = vmax.f32 %v421_v36, 0.0 }
 0x1c9   : > { %v463_v40 = vrot.slane %v424_v39, %v462_v38 }
 0x1cb   : > { %465 = vrot.lane.b32.xlu1 %v463_v40, %s721_s10  ;;  %s472_s10 = scalar_lea.sflag [#allocation3], %s251_s28 }
 0x23d   : > { %v466_v45 = vpop.permute.xlu1 %465 }
 0x23e   : > { %v468_v46 = vsel %vm433_vm6, %v459_v44, %v466_v45 }
 0x23f   : > { %470 = vst.msk [vmem:[%s253_s11] sm:$0xff] %vm469_vm10, %v468_v46 }
 0x240   : > { %666 = shalt.err (!%p663_p3)
}
 0x241   : > { %s667_s19 = scalar_lea.hbm %s852_s15, 128  ;;  %s671_s28 = scalar_lea.hbm %s901_s6, 256 }
 0x242   : > { %p668_p4 = scmp.ne.s32.totalorder %s852_s15, %s667_s19  ;;  %p672_p9 = scmp.lt.u32.totalorder %s852_s15, %s901_s6 }
 0x243   : > { %p673_p10 = scmp.lt.u32.totalorder %s671_s28, %s667_s19  ;;  %p675_p12 = scmp.lt.u32.totalorder %s667_s19, %s852_s15 }
 0x244   : > { %p669_p7 = pnand %p668_p4, %p797_p5 }
 0x245   : > { %p674_p11 = por %p673_p10, %p672_p9 }
 0x246   : > { %p670_p8 = pneg %p669_p7 }
 0x247   : > { %p676_p13 = por %p675_p12, %p674_p11 }
 0x249   : > { %p677_p0 = pnand %p676_p13, %p670_p8 }
 0x24b   : > { %680 = shalt.err (!%p677_p0)
}
 0x24c   : > { %606 = dma.vmem_to_hbm [thread:$0]  (%p797_p5), %s854_s12, 128, %s852_s15, %s472_s10  }
 0x24d PF: > { %p612_p1 = scmp.ge.s32.totalorder %s715_s24, 2  ;;  %s497_s11 = sand.u32 1, %s703_s21  }
 0x24e   : > { %s498_s13 = scalar_lea.sflag [#allocation3], %s497_s11 }
 0x24f   : > { %p609_p2 = pnand %p612_p1, %p801_p6 }
 0x251   : > { %698 = dma.done.wait (!%p609_p2), %s498_s13, 128  }
 0x252   : > { %700 = vsyncadd (!%p609_p2), %s498_s13, 4294967168  ;;  %p16_p3 = scmp.ge.s32.totalorder %s784_s27, 4   ;;  %s904_s21 = smov %s707_s22 }
 0x253   : > { %s905_s22 = smov %s711_s23  ;;  %s906_s23 = smov %s795_s30 }
 0x254   : > { %s907_s24 = smov %s784_s27  ;;  %18 = sbr.rel (!%p16_p3) target bundleno = 3 (0x3), region = 82 }
 0x25b   :  { %503 = vsyncpa [#allocation3], 1 }
 0x25c   :  { %505 = vsyncpa [#allocation3 + $0x1], 1 }

</bundles_post_ra>
